<compile_context>
chip_gen: v7x
topology: tpu7x:2x2x1
jax: 0.10.0
libtpu: 0.0.40
codegen_flags: <defaults>
</compile_context>

<pallas_src>
import functools

import jax
import jax.numpy as jnp
from jax.experimental import pallas as pl
from jax.experimental.pallas import tpu as pltpu


# ----------------------------- kernel ---------------------------------------


def _unwind_l2_kernel(pred_ref, tar_ref, w1_ref, w2_ref, db_ref, out_ref, acc_ref):
    n = pl.program_id(1)
    j = pl.program_id(2)
    nb, _, tile = pred_ref.shape
    cout, acc_w = acc_ref.shape

    @pl.when(jnp.logical_and(n == 0, j == 0))
    def _init():
        acc_ref[...] = jnp.zeros_like(acc_ref)

    w1 = w1_ref[...]
    w2 = w2_ref[...]
    db = db_ref[...]                       # (Cout, 1) f32, lane-broadcast

    partial = jnp.zeros((cout, acc_w), jnp.float32)
    for b in range(nb):                    # static unroll over the batch block
        # 1x1 convs as (Cout, Cin) @ (Cin, tile); MXU, f32 accumulation.
        p = jnp.dot(w1, pred_ref[b], preferred_element_type=jnp.float32)
        t = jnp.dot(w2, tar_ref[b], preferred_element_type=jnp.float32)
        d = (p - t) + db                   # folded bias (b1 - b2)
        dsq = d * d
        # lane fold in registers (free lane-aligned static views)
        for c0 in range(0, tile, acc_w):
            partial = partial + dsq[:, c0:c0 + acc_w]
    acc_ref[...] += partial                # single VMEM RMW per grid step

    @pl.when(jnp.logical_and(n == pl.num_programs(1) - 1,
                             j == pl.num_programs(2) - 1))
    def _finalize():
        # single cross-lane reduction per shard
        out_ref[...] = jnp.sum(acc_ref[...]).reshape(1, 1, 1)


# --------------------------- static planning --------------------------------

_TILE_CAP_LANES = 4096                     # per-batch lane width of a block
_STREAM_VMEM_BUDGET = 32 * 1024 * 1024     # 2 streams x 2 pipeline buffers
_TARGET_STREAM_BYTES = 2 * 1024 * 1024     # per-stream bytes per grid step
_ACC_MAX_LANES = 512                       # accumulator lane width after fold
_NB_UNROLL_CAP = 64                        # keep the static unroll bounded


def _ceil_to(x, m):
    return ((x + m - 1) // m) * m


def _largest_aligned_divisor(hw_pad, cap):
    """Largest multiple-of-128 divisor of hw_pad that is <= cap (hw_pad % 128 == 0)."""
    cap = max(128, (min(cap, hw_pad) // 128) * 128)
    for cand in range(cap, 127, -128):
        if hw_pad % cand == 0:
            return cand
    return 128


def _pick_nb(base, cin, tile, itemsize):
    """Divisor of `base` giving >= target bytes/step per stream within the VMEM budget."""
    per_batch = max(1, cin * tile * itemsize)
    nb_cap = max(1, min(_NB_UNROLL_CAP, _STREAM_VMEM_BUDGET // (4 * per_batch)))
    nb_want = max(1, min(_NB_UNROLL_CAP, -(-_TARGET_STREAM_BYTES // per_batch)))
    divs = [d for d in range(1, base + 1) if base % d == 0]
    feas = [d for d in divs if d <= nb_cap]
    if not feas:
        return 1
    ge = [d for d in feas if d >= nb_want]
    return min(ge) if ge else max(feas)


# ------------------------------ wrapper --------------------------------------


@functools.partial(jax.jit, static_argnames=("loss_weight",))
def unwind_l2_loss(pred, tar, w1, b1, w2, b2, *, loss_weight=1.0):
    """Pallas implementation of UnwindL2Loss.forward.

    pred, tar : (N, Cin, H, W)  NCHW activations (f32 or bf16; streamed as-is)
    w1, w2    : (Cout, Cin) or (Cout, Cin, 1, 1)  Conv2d(kernel_size=1) weights
    b1, b2    : (Cout,) biases
    """
    N, Cin, H, W = pred.shape
    HW = H * W
    w1m = w1.reshape(w1.shape[0], -1)
    w2m = w2.reshape(w2.shape[0], -1)
    Cout = w1m.shape[0]
    itemsize = jnp.dtype(pred.dtype).itemsize

    # Stream in the caller's dtype (no wrapper-side f32 copy of the activations);
    # match the (tiny) weights to the stream dtype so bf16 inputs hit the MXU as bf16.
    w_dt = jnp.bfloat16 if pred.dtype == jnp.bfloat16 else jnp.float32
    w1m = w1m.astype(w_dt)
    w2m = w2m.astype(w_dt)
    db_vec = b1.reshape(-1).astype(jnp.float32) - b2.reshape(-1).astype(jnp.float32)
    db = db_vec.reshape(Cout, 1)

    pred3 = pred.reshape(N, Cin, HW)
    tar3 = tar.astype(pred.dtype).reshape(N, Cin, HW)

    # ------------------ static plan (trace-time Python) ---------------------
    hw_pad = _ceil_to(HW, 128)
    max_tile = min(_TILE_CAP_LANES,
                   max(128, (_STREAM_VMEM_BUDGET // (4 * Cin * itemsize)) // 128 * 128))
    tile = _largest_aligned_divisor(hw_pad, max_tile)

    if N % 2 == 0:
        # shard the batch axis across the 2-way "parallel" grid dim (v7x megacore)
        half = N // 2
        nb = _pick_nb(half, Cin, tile, itemsize)
        n_blocks = half // nb
        J = hw_pad // tile
        grid = (2, n_blocks, J)

        def data_idx(s, n, j, _nblk=n_blocks):
            return (s * _nblk + n, 0, j)
    else:
        # N odd: shard the spatial tile axis instead (pad HW to a multiple of
        # 2*tile; the pad contribution is subtracted analytically below).
        hw_pad = _ceil_to(hw_pad, 2 * tile)
        J = hw_pad // tile
        half_j = J // 2
        nb = _pick_nb(N, Cin, tile, itemsize)
        n_blocks = N // nb
        grid = (2, n_blocks, half_j)

        def data_idx(s, n, j, _hj=half_j):
            return (n, 0, s * _hj + j)

    pad_cols = hw_pad - HW
    if pad_cols:
        pred3 = jnp.pad(pred3, ((0, 0), (0, 0), (0, pad_cols)))
        tar3 = jnp.pad(tar3, ((0, 0), (0, 0), (0, pad_cols)))

    acc_w = min(tile, _ACC_MAX_LANES)

    # VMEM accounting for all residents; cap at 48 MiB (safe on v7x's 64 MiB/TC).
    stream_bytes = 2 * 2 * nb * Cin * tile * itemsize          # 2 streams x 2 buffers
    resident_bytes = (Cout * acc_w * 4                          # accumulator scratch
                      + 2 * 2 * Cout * Cin * 4                  # w1, w2 (double-buffered)
                      + 2 * Cout * 4 + 64)                      # db + out
    vmem_limit = min(48 * 1024 * 1024,
                     max(stream_bytes + resident_bytes + (4 << 20), 16 * 1024 * 1024))

    partials = pl.pallas_call(
        _unwind_l2_kernel,
        out_shape=jax.ShapeDtypeStruct((2, 1, 1), jnp.float32),
        grid_spec=pltpu.PrefetchScalarGridSpec(
            num_scalar_prefetch=0,
            grid=grid,
            in_specs=[
                pl.BlockSpec((nb, Cin, tile), data_idx),               # pred block
                pl.BlockSpec((nb, Cin, tile), data_idx),               # tar block
                pl.BlockSpec((Cout, Cin), lambda s, n, j: (0, 0)),     # w1 (resident)
                pl.BlockSpec((Cout, Cin), lambda s, n, j: (0, 0)),     # w2 (resident)
                pl.BlockSpec((Cout, 1), lambda s, n, j: (0, 0)),       # b1 - b2
            ],
            out_specs=pl.BlockSpec((1, 1, 1), lambda s, n, j: (s, 0, 0)),
            scratch_shapes=[pltpu.VMEM((Cout, acc_w), jnp.float32)],
        ),
        compiler_params=pltpu.CompilerParams(
            dimension_semantics=("parallel", "arbitrary", "arbitrary"),
            vmem_limit_bytes=vmem_limit,
        ),
    )(pred3, tar3, w1m, w2m, db)

    total = jnp.sum(partials)
    if pad_cols:
        # padded columns contribute exactly (b1 - b2)^2 per output channel
        total = total - jnp.float32(N * pad_cols) * jnp.sum(db_vec * db_vec)

    denom = N * Cout * H * W
    return (total / denom) * loss_weight


# ------------------------------ self-check -----------------------------------


def _reference_loss(pred, tar, w1, b1, w2, b2, loss_weight):
    # plain-JAX reference of F.mse_loss(conv1(pred), conv2(tar)) * loss_weight
    a = jnp.einsum('nchw,oc->nohw', pred, w1) + b1.reshape(1, -1, 1, 1)
    b = jnp.einsum('nchw,oc->nohw', tar, w2) + b2.reshape(1, -1, 1, 1)
    return jnp.mean((a - b) ** 2) * loss_weight


if __name__ == "__main__":
    key = jax.random.PRNGKey(0)
    k_pred, k_tar, k_w1, k_b1, k_w2, k_b2 = jax.random.split(key, 6)

    N, Cin, Cout, H, W = 2, 4, 4, 16, 16
    loss_weight = 1.0

    pred = jax.random.normal(k_pred, (N, Cin, H, W), dtype=jnp.float32)
    tar = jax.random.normal(k_tar, (N, Cin, H, W), dtype=jnp.float32)

    # deterministic Conv2d(kernel_size=1) parameter init (PyTorch-style uniform bound)
    bound = 1.0 / (Cin ** 0.5)
    w1 = jax.random.uniform(k_w1, (Cout, Cin), jnp.float32, -bound, bound)
    b1 = jax.random.uniform(k_b1, (Cout,), jnp.float32, -bound, bound)
    w2 = jax.random.uniform(k_w2, (Cout, Cin), jnp.float32, -bound, bound)
    b2 = jax.random.uniform(k_b2, (Cout,), jnp.float32, -bound, bound)

    loss = unwind_l2_loss(pred, tar, w1, b1, w2, b2, loss_weight=loss_weight)
    loss = jax.block_until_ready(loss)

    ref = _reference_loss(pred, tar, w1, b1, w2, b2, loss_weight)
    ref = jax.block_until_ready(ref)

    assert jnp.allclose(loss, ref, rtol=1e-5, atol=1e-6), (loss, ref)
    print("KERNEL_OK")
</pallas_src>

<mosaic_0001>
module attributes {stable_mosaic.version = 11 : i64} {
  func.func @_unwind_l2_kernel(%arg0: i32, %arg1: i32, %arg2: i32, %arg3: memref<1x4x256xf32, #tpu.memory_space<vmem>>, %arg4: memref<1x4x256xf32, #tpu.memory_space<vmem>>, %arg5: memref<4x4xf32, #tpu.memory_space<vmem>>, %arg6: memref<4x4xf32, #tpu.memory_space<vmem>>, %arg7: memref<4x1xf32, #tpu.memory_space<vmem>>, %arg8: memref<1x1x1xf32, #tpu.memory_space<vmem>>, %arg9: memref<4x256xf32, #tpu.memory_space<vmem>>) attributes {dimension_semantics = [#tpu.dimension_semantics<parallel>, #tpu.dimension_semantics<arbitrary>, #tpu.dimension_semantics<arbitrary>], iteration_bounds = array<i64: 2, 1, 1>, scalar_prefetch = 0 : i64, scratch_operands = 1 : i64, tpu.core_type = #tpu.core_type<tc>, window_params = [{transform_indices = @transform_0, window_bounds = array<i64: 1, 4, 256>}, {transform_indices = @transform_1, window_bounds = array<i64: 1, 4, 256>}, {pipeline_mode = #tpu.pipeline_mode<synchronous>, transform_indices = @transform_2, window_bounds = array<i64: 4, 4>}, {pipeline_mode = #tpu.pipeline_mode<synchronous>, transform_indices = @transform_3, window_bounds = array<i64: 4, 4>}, {pipeline_mode = #tpu.pipeline_mode<synchronous>, transform_indices = @transform_4, window_bounds = array<i64: 4, 1>}, {transform_indices = @transform_5, window_bounds = array<i64: 1, 1, 1>}]} {
    %c0_i32 = arith.constant 0 : i32
    %0 = arith.cmpi eq, %arg1, %c0_i32 : i32
    %c0_i32_0 = arith.constant 0 : i32
    %1 = arith.cmpi eq, %arg2, %c0_i32_0 : i32
    %2 = arith.andi %0, %1 : i1
    %3 = arith.extui %2 : i1 to i32
    %c0_i32_1 = arith.constant 0 : i32
    %4 = arith.cmpi ne, %3, %c0_i32_1 : i32
    scf.if %4 {
      %cst_22 = arith.constant 0.000000e+00 : f32
      %28 = vector.broadcast %cst_22 : f32 to vector<4x256xf32>
      %c0_23 = arith.constant 0 : index
      %c0_24 = arith.constant 0 : index
      %29 = vector.load %arg9[%c0_23, %c0_24] : memref<4x256xf32, #tpu.memory_space<vmem>>, vector<4x256xf32>
      tpu.vector_store %arg9[%c0_23, %c0_24], %28 {strides = array<i32>} : memref<4x256xf32, #tpu.memory_space<vmem>>, vector<4x256xf32>,
    } else {
    }
    %c0 = arith.constant 0 : index
    %c0_2 = arith.constant 0 : index
    %5 = vector.load %arg5[%c0, %c0_2] : memref<4x4xf32, #tpu.memory_space<vmem>>, vector<4x4xf32>
    %c0_3 = arith.constant 0 : index
    %c0_4 = arith.constant 0 : index
    %6 = vector.load %arg6[%c0_3, %c0_4] : memref<4x4xf32, #tpu.memory_space<vmem>>, vector<4x4xf32>
    %c0_5 = arith.constant 0 : index
    %c0_6 = arith.constant 0 : index
    %7 = vector.load %arg7[%c0_5, %c0_6] : memref<4x1xf32, #tpu.memory_space<vmem>>, vector<4x1xf32>
    %cst = arith.constant 0.000000e+00 : f32
    %8 = vector.broadcast %cst : f32 to vector<4x256xf32>
    %c0_7 = arith.constant 0 : index
    %c0_8 = arith.constant 0 : index
    %c0_9 = arith.constant 0 : index
    %9 = vector.load %arg3[%c0_7, %c0_8, %c0_9] : memref<1x4x256xf32, #tpu.memory_space<vmem>>, vector<1x4x256xf32>
    %10 = vector.shape_cast %9 : vector<1x4x256xf32> to vector<4x256xf32>
    %cst_10 = arith.constant dense<0.000000e+00> : vector<4x256xf32>
    %11 = tpu.matmul %5, %10, %cst_10 {dimension_numbers = #tpu.dot_dimension_numbers<[1], [0], [0], [1], [0, 0, 1, 1], [], []>} : vector<4x4xf32>, vector<4x256xf32>, vector<4x256xf32> -> vector<4x256xf32>
    %c0_11 = arith.constant 0 : index
    %c0_12 = arith.constant 0 : index
    %c0_13 = arith.constant 0 : index
    %12 = vector.load %arg4[%c0_11, %c0_12, %c0_13] : memref<1x4x256xf32, #tpu.memory_space<vmem>>, vector<1x4x256xf32>
    %13 = vector.shape_cast %12 : vector<1x4x256xf32> to vector<4x256xf32>
    %cst_14 = arith.constant dense<0.000000e+00> : vector<4x256xf32>
    %14 = tpu.matmul %6, %13, %cst_14 {dimension_numbers = #tpu.dot_dimension_numbers<[1], [0], [0], [1], [0, 0, 1, 1], [], []>} : vector<4x4xf32>, vector<4x256xf32>, vector<4x256xf32> -> vector<4x256xf32>
    %15 = arith.subf %11, %14 : vector<4x256xf32>
    %16 = vector.broadcast %7 : vector<4x1xf32> to vector<4x256xf32>
    %17 = arith.addf %15, %16 : vector<4x256xf32>
    %18 = arith.mulf %17, %17 : vector<4x256xf32>
    %19 = arith.addf %8, %18 : vector<4x256xf32>
    %c0_15 = arith.constant 0 : index
    %c0_16 = arith.constant 0 : index
    %20 = vector.load %arg9[%c0_15, %c0_16] : memref<4x256xf32, #tpu.memory_space<vmem>>, vector<4x256xf32>
    %21 = arith.addf %20, %19 : vector<4x256xf32>
    %c0_17 = arith.constant 0 : index
    %c0_18 = arith.constant 0 : index
    %22 = vector.load %arg9[%c0_17, %c0_18] : memref<4x256xf32, #tpu.memory_space<vmem>>, vector<4x256xf32>
    tpu.vector_store %arg9[%c0_17, %c0_18], %21 {strides = array<i32>} : memref<4x256xf32, #tpu.memory_space<vmem>>, vector<4x256xf32>,
    %c0_i32_19 = arith.constant 0 : i32
    %23 = arith.cmpi eq, %arg1, %c0_i32_19 : i32
    %c0_i32_20 = arith.constant 0 : i32
    %24 = arith.cmpi eq, %arg2, %c0_i32_20 : i32
    %25 = arith.andi %23, %24 : i1
    %26 = arith.extui %25 : i1 to i32
    %c0_i32_21 = arith.constant 0 : i32
    %27 = arith.cmpi ne, %26, %c0_i32_21 : i32
    scf.if %27 {
      %c0_22 = arith.constant 0 : index
      %c0_23 = arith.constant 0 : index
      %28 = vector.load %arg9[%c0_22, %c0_23] : memref<4x256xf32, #tpu.memory_space<vmem>>, vector<4x256xf32>
      %29 = vector.shape_cast %28 : vector<4x256xf32> to vector<1x4x256xf32>
      %cst_24 = arith.constant dense<0.000000e+00> : vector<1xf32>
      %30 = vector.multi_reduction <add>, %29, %cst_24 [1, 2] : vector<1x4x256xf32> to vector<1xf32>
      %31 = vector.shape_cast %30 : vector<1xf32> to vector<1x1x1xf32>
      %32 = vector.extract %31[0, 0, 0] : f32 from vector<1x1x1xf32>
      %33 = vector.broadcast %32 : f32 to vector<1x1x1xf32>
      %c0_25 = arith.constant 0 : index
      %c0_26 = arith.constant 0 : index
      %c0_27 = arith.constant 0 : index
      %34 = vector.load %arg8[%c0_25, %c0_26, %c0_27] : memref<1x1x1xf32, #tpu.memory_space<vmem>>, vector<1x1x1xf32>
      tpu.vector_store %arg8[%c0_25, %c0_26, %c0_27], %33 {strides = array<i32>} : memref<1x1x1xf32, #tpu.memory_space<vmem>>, vector<1x1x1xf32>,
    } else {
    }
    return
  }
  func.func @transform_0(%arg0: i32, %arg1: i32, %arg2: i32) -> (i32, i32, i32) {
    %c1_i32 = arith.constant 1 : i32
    %0 = arith.muli %arg0, %c1_i32 : i32
    %1 = arith.addi %0, %arg1 : i32
    %c0_i32 = arith.constant 0 : i32
    %c0_i32_0 = arith.constant 0 : i32
    return %1, %c0_i32, %arg2 : i32, i32, i32
  }
  func.func @transform_1(%arg0: i32, %arg1: i32, %arg2: i32) -> (i32, i32, i32) {
    %c1_i32 = arith.constant 1 : i32
    %0 = arith.muli %arg0, %c1_i32 : i32
    %1 = arith.addi %0, %arg1 : i32
    %c0_i32 = arith.constant 0 : i32
    %c0_i32_0 = arith.constant 0 : i32
    return %1, %c0_i32, %arg2 : i32, i32, i32
  }
  func.func @transform_2(%arg0: i32, %arg1: i32, %arg2: i32) -> (i32, i32) {
    %c0_i32 = arith.constant 0 : i32
    %c0_i32_0 = arith.constant 0 : i32
    %c0_i32_1 = arith.constant 0 : i32
    return %c0_i32, %c0_i32_0 : i32, i32
  }
  func.func @transform_3(%arg0: i32, %arg1: i32, %arg2: i32) -> (i32, i32) {
    %c0_i32 = arith.constant 0 : i32
    %c0_i32_0 = arith.constant 0 : i32
    %c0_i32_1 = arith.constant 0 : i32
    return %c0_i32, %c0_i32_0 : i32, i32
  }
  func.func @transform_4(%arg0: i32, %arg1: i32, %arg2: i32) -> (i32, i32) {
    %c0_i32 = arith.constant 0 : i32
    %c0_i32_0 = arith.constant 0 : i32
    %c0_i32_1 = arith.constant 0 : i32
    return %c0_i32, %c0_i32_0 : i32, i32
  }
  func.func @transform_5(%arg0: i32, %arg1: i32, %arg2: i32) -> (i32, i32, i32) {
    %c0_i32 = arith.constant 0 : i32
    %c0_i32_0 = arith.constant 0 : i32
    %c0_i32_1 = arith.constant 0 : i32
    return %arg0, %c0_i32, %c0_i32_0 : i32, i32, i32
  }
}

</mosaic_0001>

<bundles_post_ra>
// kernel: unwind_l2_loss.1
= control target key start
LH: loop header
LB: loop body
LE: loop exit
PB: predicated region body
PF: predicated region fallthrough
CT: control target
= control target key end

     0   :  { %s710_s18 = smov 0   ;;  %s712_s19 = smov 0   ;;  %s765_s0 = inlined_call_operand.vmem [shape: f32[2,4,256], index: 0, kind: input, shape index: {}]   ;;  %s766_s1 = inlined_call_operand.vmem [shape: f32[2,4,256], index: 1, kind: input, shape index: {}]   ;;  %s767_s2 = inlined_call_operand.vmem [shape: f32[4,4], index: 2, kind: input, shape index: {}]   ;;  %s768_s3 = inlined_call_operand.vmem [shape: f32[4,4], index: 3, kind: input, shape index: {}]   ;;  %s769_s4 = inlined_call_operand.vmem [shape: f32[4,1], index: 4, kind: input, shape index: {}]   ;;  %s770_s5 = inlined_call_operand.vmem [shape: f32[2,1,1], index: 5, kind: output, shape index: {}]  }
   0x1   :  { %s714_s20 = smov 0  }
   0x2 LB: > { %s34_s21 = sadd.s32 1, %s672_s19  ;;  %p607_p0 = scmp.ge.s32.totalorder %s676_s20, 1  ;;  %s676_s20 = sphi %s714_s20, %s15_s20   ;;  %s672_s19 = sphi %s712_s19, %s772_s19   ;;  %s668_s18 = sphi %s710_s18, %s771_s18  }
   0x3   : > { %p36_p1 = scmp.ge.s32.totalorder %s34_s21, 2  ;;  %p238_p2 = scmp.lt.s32.totalorder %s676_s20, 3 }
   0x5   : > { %s774_s21 = smov (%p36_p1, %s34_s21), 0  ;;  %p239_p3 = pnand %p607_p0, %p238_p2 }
   0x6   : > { %p281_p4 = scmp.lt.s32.totalorder (!%p239_p3), %s668_s18, 1  ;;  %v678_v0 = vmov (!%p239_p3), 0.0   ;;  %v315_v1 = vld [vmem:[%s769_s4] sm:$0xf] (!%p239_p3)  ;;  %v679_v2 = vmov (!%p239_p3), 0   ;;  %vm323_vm0 = vcmask (!%p239_p3), 1043456  }
   0x7   : > { %242 = sbr.rel (%p239_p3) target bundleno = 453 (0x1c5), region = 40  ;;  %392 = vmatprep.mubr.f32.mxu0 (!%p239_p3), %v678_v0  ;;  %473 = vmatprep.mubr.f32.mxu1 (!%p239_p3), %v678_v0  ;;  %v313_v7 = vld [vmem:[%s767_s2] sm:$0xf] (!%p239_p3)  ;;  %vm319_vm1 = vcmask (!%p239_p3), 31744   ;;  %vm519_vm2 = vcmask (!%p239_p3), 0  }
   0x8   : > { %651 = vset.pattern.permute.xlu0 (!%p239_p3), %v679_v2  ;;  %v314_v8 = vld [vmem:[%s768_s3] sm:$0xf] (!%p239_p3) }
   0x9   : > { %484 = vperm.xlu0 (!%p239_p3), %651, %v315_v1  }
   0xe   : > { %s776_s18 = smov (!%p281_p4, %s668_s18), 1 }
   0xf   : > { %s620_s24 = sshll.u32 %s776_s18, 3  ;;  %s305_s12 = scalar_lea.vmem %s770_s5, %s776_s18 }
  0x10   : > { %s288_s27 = scalar_lea.vmem %s765_s0, %s620_s24  ;;  %s300_s30 = scalar_lea.vmem %s766_s1, %s620_s24 }
  0x11   : > { %v316_v3 = vld [vmem:[%s288_s27] sm:$0xff] }
  0x12   : > { %v399_v4 = vld [vmem:[%s300_s30] sm:$0xff]  ;;  %v318_v5 = vcombine.high %v316_v3, %v316_v3 }
  0x13   : > { %v401_v6 = vcombine.high %v399_v4, %v399_v4 }
  0x14   : > { %612 = vmatprep.subr.msk.mxu0 %vm323_vm0, %v318_v5 }
  0x15   : > { %615 = vmatprep.subr.msk.mxu1 %vm323_vm0, %v401_v6  ;;  %613 = vmatpush1.msk.msra.mxu0 %vm323_vm0, %v316_v3 }
  0x16   : > { %616 = vmatpush1.msk.msra.mxu1 %vm323_vm0, %v399_v4  ;;  %614 = vmatmul.mubr.msk.f32.vlgmr.msra.gmra.mrb[0].mxu0 %vm319_vm1, %v313_v7 }
  0x17   : > { %617 = vmatmul.mubr.msk.f32.vlgmr.msra.gmra.mrb[0].mxu1 %vm319_vm1, %v314_v8 }
  0x88   : > { %v485_v9 = vpop.permute.xlu0 %484 }
  0xe9   : > { %v394_v10 = vpop.f32.mrb[0].mxu0 }
  0xea   : > { %v475_v11 = vpop.f32.mrb[0].mxu1  ;;  %v396_v13 = vpop.f32.mrb[1].mxu0 }
  0xeb   : > { %v480_v12 = vsub.f32 %v394_v10, %v475_v11  ;;  %v477_v14 = vpop.f32.mrb[1].mxu1 }
  0xec   : > { %v481_v15 = vsub.f32 %v396_v13, %v477_v14 }
  0xed   : > { %v487_v16 = vadd.f32 %v485_v9, %v480_v12 }
  0xee   : > { %v488_v17 = vadd.f32 %v485_v9, %v481_v15 }
  0xef   : > { %v489_v18 = vmul.f32 %v487_v16, %v487_v16 }
  0xf0   : > { %v490_v19 = vmul.f32 %v488_v17, %v488_v17 }
  0xf2   : > { %v496_v20 = vcombine.low %v489_v18, %v490_v19  ;;  %v622_v21 = vcombine.low %v490_v19, %v490_v19 }
  0xf4   : > { %v506_v22 = vsel %vm323_vm0, %v496_v20, 0.0  ;;  %v507_v23 = vsel %vm323_vm0, %v622_v21, 0.0 }
  0xf5   : > { %v508_v24 = vadd.f32 %v507_v23, %v506_v22 }
  0xf7   : > { %509 = vadd.xlane.f32.xlu0 %v508_v24 }
 0x184   : > { %v510_v25 = vpop.xlane.xlu0 %509 }
 0x185   : > { %v511_v26 = vrot.slane %v510_v25, 4 }
 0x187   : > { %v512_v27 = vadd.f32 %v511_v26, %v510_v25 }
 0x189   : > { %v513_v28 = vrot.slane %v512_v27, 2 }
 0x18b   : > { %v514_v29 = vadd.f32 %v513_v28, %v512_v27 }
 0x18d   : > { %v515_v30 = vrot.slane %v514_v29, 1 }
 0x18f   : > { %v516_v31 = vadd.f32 %v515_v30, %v514_v29 }
 0x191   : > { %623 = vpush %v516_v31 }
 0x1c2   : > { %s624_s13 = spop %623 }
 0x1c3   : > { %v518_v32 = vstv %s624_s13 }
 0x1c4   : > { %520 = vst.msk [vmem:[%s305_s12] sm:$0x1] %vm519_vm2, %v518_v32 }
 0x1c5 PF: > { %s15_s20 = sadd.s32 1, %s676_s20   ;;  %s771_s18 = smov %s672_s19 }
 0x1c6   : > { %p12_p5 = scmp.ge.s32.totalorder %s15_s20, 4   ;;  %s772_s19 = smov %s774_s21 }
 0x1c8   :  { %14 = sbr.rel (!%p12_p5) target bundleno = 2 (0x2), region = 81 }

</bundles_post_ra>
